<compile_context>
chip_gen: v5e
topology: v5e:2x2
jax: 0.10.0
libtpu: 0.0.40
codegen_flags: <defaults>
</compile_context>

<pallas_src>
import jax
import jax.numpy as jnp
from jax.experimental import pallas as pl
from jax.experimental.pallas import tpu as pltpu

HIDDEN1 = 128
HIDDEN2 = 64
SUBLANE = 8
MAX_TILE_ROWS = 1024


def _round_up(n, m):
    return ((n + m - 1) // m) * m


def mlp_kernel(x_ref, w1_ref, b1_ref, w2_ref, b2_ref, w3_ref, b3_ref, o_ref):
    # x streams from HBM as f32 (4 B/elem once); cast to bf16 on the VPU here
    # instead of a separate wrapper-side XLA pass.
    x = x_ref[...].astype(jnp.bfloat16)
    # fc1 + ReLU  (bf16 operands, f32 MXU accumulation, f32 elementwise)
    h1 = jnp.dot(x, w1_ref[...], preferred_element_type=jnp.float32)
    h1 = jnp.maximum(h1 + b1_ref[...], 0.0)
    # dropout(p=0.5): identity in eval mode
    # fc2 + ReLU
    h2 = jnp.dot(h1.astype(jnp.bfloat16), w2_ref[...],
                 preferred_element_type=jnp.float32)
    h2 = jnp.maximum(h2 + b2_ref[...], 0.0)
    # dropout(p=0.5): identity in eval mode
    # fc3 (no activation) -> unpadded (tb, out_dim) f32 store
    h3 = jnp.dot(h2.astype(jnp.bfloat16), w3_ref[...],
                 preferred_element_type=jnp.float32)
    o_ref[...] = (h3 + b3_ref[...]).astype(o_ref.dtype)


def _pick_batch_tile(batch, batch_tile):
    if batch_tile is not None:
        assert batch_tile % SUBLANE == 0, "batch_tile must be a multiple of 8"
        return batch_tile
    b8 = _round_up(batch, SUBLANE)
    if b8 <= 2 * SUBLANE:
        # Too small to split usefully: single step (fine on 1-TC v5e/v6e;
        # v7x loses nothing meaningful at <= 16 rows).
        return b8
    # Largest tiles (big DMA bursts, few ~0.35us step overheads) with an even
    # step count >= 2 so both v7x TensorCores get balanced work.
    steps = max(2, 2 * pl.cdiv(b8, 2 * MAX_TILE_ROWS))
    return _round_up(pl.cdiv(b8, steps), SUBLANE)


def prepare_params(params):
    """One-time conversion of params into kernel-ready arrays.

    Weights become bf16 MXU operands (f32 accumulation in-kernel); biases stay
    f32. Done once at init, not per forward call, so the per-call path has no
    extra pad/cast XLA ops or HBM passes.
    """
    return dict(
        w1=params["w1"].astype(jnp.bfloat16),
        b1=params["b1"].astype(jnp.float32),
        w2=params["w2"].astype(jnp.bfloat16),
        b2=params["b2"].astype(jnp.float32),
        w3=params["w3"].astype(jnp.bfloat16),
        b3=params["b3"].astype(jnp.float32),
    )


def chatbot_forward(x, prepared, *, batch_tile=None):
    """x: (B, input_size) float32. prepared: output of prepare_params()."""
    B, in_dim = x.shape
    w1, b1 = prepared["w1"], prepared["b1"]   # (in, 128) bf16, (1, 128) f32
    w2, b2 = prepared["w2"], prepared["b2"]   # (128, 64) bf16, (1, 64)  f32
    w3, b3 = prepared["w3"], prepared["b3"]   # (64, out) bf16, (1, out) f32
    out_dim = w3.shape[1]

    tb = _pick_batch_tile(B, batch_tile)
    grid = (pl.cdiv(B, tb),)   # ragged last block handled by Pallas clipping

    weight_bytes = (w1.size + w2.size + w3.size) * 2 \
        + (b1.size + b2.size + b3.size) * 4
    flops = 2 * B * (in_dim * HIDDEN1 + HIDDEN1 * HIDDEN2 + HIDDEN2 * out_dim)
    cost = pl.CostEstimate(
        flops=flops,
        transcendentals=0,
        bytes_accessed=B * in_dim * 4 + B * out_dim * 4 + weight_bytes,
    )

    # VMEM: double-buffered f32 x/out tiles + single-buffered weights/biases
    # (pl.Buffered(1)) + f32 intermediates, with 2x headroom. A few MiB even at
    # tb=1024, well inside v7x's 64 MiB physical / 32 MiB default scoped VMEM.
    per_step_io = tb * in_dim * 4 + tb * out_dim * 4
    intermediates = tb * (2 * HIDDEN1 + 2 * HIDDEN2) * 4
    vmem_need = 2 * per_step_io + weight_bytes + intermediates
    vmem_limit = int(min(max(2 * vmem_need, 2 * 1024 * 1024),
                         32 * 1024 * 1024))

    weight_mode = pl.Buffered(1)   # grid-invariant: fetched once, no 2x buffer
    out = pl.pallas_call(
        mlp_kernel,
        out_shape=jax.ShapeDtypeStruct((B, out_dim), jnp.float32),
        grid_spec=pltpu.PrefetchScalarGridSpec(
            num_scalar_prefetch=0,
            grid=grid,
            in_specs=[
                pl.BlockSpec((tb, in_dim), lambda i: (i, 0)),       # x tile (f32)
                pl.BlockSpec(w1.shape, lambda i: (0, 0), pipeline_mode=weight_mode),
                pl.BlockSpec(b1.shape, lambda i: (0, 0), pipeline_mode=weight_mode),
                pl.BlockSpec(w2.shape, lambda i: (0, 0), pipeline_mode=weight_mode),
                pl.BlockSpec(b2.shape, lambda i: (0, 0), pipeline_mode=weight_mode),
                pl.BlockSpec(w3.shape, lambda i: (0, 0), pipeline_mode=weight_mode),
                pl.BlockSpec(b3.shape, lambda i: (0, 0), pipeline_mode=weight_mode),
            ],
            out_specs=pl.BlockSpec((tb, out_dim), lambda i: (i, 0)),  # unpadded
        ),
        compiler_params=pltpu.CompilerParams(
            dimension_semantics=("parallel",),
            vmem_limit_bytes=vmem_limit,
        ),
        cost_estimate=cost,
    )(x, w1, b1, w2, b2, w3, b3)

    return out


def init_params(key, input_size, output_size):
    """Deterministic init mirroring nn.Linear shapes; weights stored transposed."""
    ks = jax.random.split(key, 6)

    def lin(kw, kb, fan_in, fan_out):
        bound = 1.0 / jnp.sqrt(fan_in)
        w = jax.random.uniform(kw, (fan_in, fan_out), jnp.float32, -bound, bound)
        b = jax.random.uniform(kb, (1, fan_out), jnp.float32, -bound, bound)
        return w, b

    w1, b1 = lin(ks[0], ks[1], input_size, HIDDEN1)
    w2, b2 = lin(ks[2], ks[3], HIDDEN1, HIDDEN2)
    w3, b3 = lin(ks[4], ks[5], HIDDEN2, output_size)
    return dict(w1=w1, b1=b1, w2=w2, b2=b2, w3=w3, b3=b3)


def reference_forward(x, p):
    h = jnp.maximum(x @ p["w1"] + p["b1"], 0.0)
    h = jnp.maximum(h @ p["w2"] + p["b2"], 0.0)
    return h @ p["w3"] + p["b3"]


if __name__ == "__main__":
    key = jax.random.PRNGKey(0)
    k_x, k_p = jax.random.split(key)

    batch, input_size, output_size = 64, 32, 16
    x = jax.random.normal(k_x, (batch, input_size), jnp.float32)
    params = init_params(k_p, input_size, output_size)
    prepared = prepare_params(params)   # one-time bf16 weight prep (hoisted)

    # Heuristic picks tb=32 -> grid=(2,): two equal "parallel" steps so dual-TC
    # v7x balances; on single-TC v5e/v6e the extra step is ~0.35us of noise.
    out = chatbot_forward(x, prepared)
    out = jax.block_until_ready(out)

    ref = reference_forward(x, params)
    assert out.shape == (batch, output_size)
    # bf16 matmul operands with f32 accumulation vs. pure-f32 reference.
    assert jnp.allclose(out, ref, atol=5e-2, rtol=5e-2), "mismatch vs reference"

    print("KERNEL_OK")
</pallas_src>

<mosaic_0001>
module attributes {stable_mosaic.version = 11 : i64} {
  func.func @mlp_kernel(%arg0: i32, %arg1: memref<32x32xf32, #tpu.memory_space<vmem>>, %arg2: memref<32x128xbf16, #tpu.memory_space<vmem>>, %arg3: memref<1x128xf32, #tpu.memory_space<vmem>>, %arg4: memref<128x64xbf16, #tpu.memory_space<vmem>>, %arg5: memref<1x64xf32, #tpu.memory_space<vmem>>, %arg6: memref<64x16xbf16, #tpu.memory_space<vmem>>, %arg7: memref<1x16xf32, #tpu.memory_space<vmem>>, %arg8: memref<32x16xf32, #tpu.memory_space<vmem>>) attributes {dimension_semantics = [#tpu.dimension_semantics<parallel>], iteration_bounds = array<i64: 2>, scalar_prefetch = 0 : i64, scratch_operands = 0 : i64, tpu.core_type = #tpu.core_type<tc>, window_params = [{transform_indices = @transform_0, window_bounds = array<i64: 32, 32>}, {pipeline_mode = #tpu.pipeline_mode<synchronous>, transform_indices = @transform_1, window_bounds = array<i64: 32, 128>}, {pipeline_mode = #tpu.pipeline_mode<synchronous>, transform_indices = @transform_2, window_bounds = array<i64: 1, 128>}, {pipeline_mode = #tpu.pipeline_mode<synchronous>, transform_indices = @transform_3, window_bounds = array<i64: 128, 64>}, {pipeline_mode = #tpu.pipeline_mode<synchronous>, transform_indices = @transform_4, window_bounds = array<i64: 1, 64>}, {pipeline_mode = #tpu.pipeline_mode<synchronous>, transform_indices = @transform_5, window_bounds = array<i64: 64, 16>}, {pipeline_mode = #tpu.pipeline_mode<synchronous>, transform_indices = @transform_6, window_bounds = array<i64: 1, 16>}, {transform_indices = @transform_7, window_bounds = array<i64: 32, 16>}]} {
    %c0 = arith.constant 0 : index
    %c0_0 = arith.constant 0 : index
    %0 = vector.load %arg1[%c0, %c0_0] : memref<32x32xf32, #tpu.memory_space<vmem>>, vector<32x32xf32>
    %1 = arith.truncf %0 : vector<32x32xf32> to vector<32x32xbf16>
    %c0_1 = arith.constant 0 : index
    %c0_2 = arith.constant 0 : index
    %2 = vector.load %arg2[%c0_1, %c0_2] : memref<32x128xbf16, #tpu.memory_space<vmem>>, vector<32x128xbf16>
    %cst = arith.constant dense<0.000000e+00> : vector<32x128xf32>
    %3 = tpu.matmul %1, %2, %cst {dimension_numbers = #tpu.dot_dimension_numbers<[1], [0], [0], [1], [0, 0, 1, 1], [], []>} : vector<32x32xbf16>, vector<32x128xbf16>, vector<32x128xf32> -> vector<32x128xf32>
    %c0_3 = arith.constant 0 : index
    %c0_4 = arith.constant 0 : index
    %4 = vector.load %arg3[%c0_3, %c0_4] : memref<1x128xf32, #tpu.memory_space<vmem>>, vector<1x128xf32>
    %5 = vector.broadcast %4 : vector<1x128xf32> to vector<32x128xf32>
    %6 = arith.addf %3, %5 : vector<32x128xf32>
    %cst_5 = arith.constant 0.000000e+00 : f32
    %7 = vector.broadcast %cst_5 : f32 to vector<32x128xf32>
    %8 = arith.maximumf %6, %7 : vector<32x128xf32>
    %9 = arith.truncf %8 : vector<32x128xf32> to vector<32x128xbf16>
    %c0_6 = arith.constant 0 : index
    %c0_7 = arith.constant 0 : index
    %10 = vector.load %arg4[%c0_6, %c0_7] : memref<128x64xbf16, #tpu.memory_space<vmem>>, vector<128x64xbf16>
    %cst_8 = arith.constant dense<0.000000e+00> : vector<32x64xf32>
    %11 = tpu.matmul %9, %10, %cst_8 {dimension_numbers = #tpu.dot_dimension_numbers<[1], [0], [0], [1], [0, 0, 1, 1], [], []>} : vector<32x128xbf16>, vector<128x64xbf16>, vector<32x64xf32> -> vector<32x64xf32>
    %c0_9 = arith.constant 0 : index
    %c0_10 = arith.constant 0 : index
    %12 = vector.load %arg5[%c0_9, %c0_10] : memref<1x64xf32, #tpu.memory_space<vmem>>, vector<1x64xf32>
    %13 = vector.broadcast %12 : vector<1x64xf32> to vector<32x64xf32>
    %14 = arith.addf %11, %13 : vector<32x64xf32>
    %cst_11 = arith.constant 0.000000e+00 : f32
    %15 = vector.broadcast %cst_11 : f32 to vector<32x64xf32>
    %16 = arith.maximumf %14, %15 : vector<32x64xf32>
    %17 = arith.truncf %16 : vector<32x64xf32> to vector<32x64xbf16>
    %c0_12 = arith.constant 0 : index
    %c0_13 = arith.constant 0 : index
    %18 = vector.load %arg6[%c0_12, %c0_13] : memref<64x16xbf16, #tpu.memory_space<vmem>>, vector<64x16xbf16>
    %cst_14 = arith.constant dense<0.000000e+00> : vector<32x16xf32>
    %19 = tpu.matmul %17, %18, %cst_14 {dimension_numbers = #tpu.dot_dimension_numbers<[1], [0], [0], [1], [0, 0, 1, 1], [], []>} : vector<32x64xbf16>, vector<64x16xbf16>, vector<32x16xf32> -> vector<32x16xf32>
    %c0_15 = arith.constant 0 : index
    %c0_16 = arith.constant 0 : index
    %20 = vector.load %arg7[%c0_15, %c0_16] : memref<1x16xf32, #tpu.memory_space<vmem>>, vector<1x16xf32>
    %21 = vector.broadcast %20 : vector<1x16xf32> to vector<32x16xf32>
    %22 = arith.addf %19, %21 : vector<32x16xf32>
    %c0_17 = arith.constant 0 : index
    %c0_18 = arith.constant 0 : index
    %23 = vector.load %arg8[%c0_17, %c0_18] : memref<32x16xf32, #tpu.memory_space<vmem>>, vector<32x16xf32>
    tpu.vector_store %arg8[%c0_17, %c0_18], %22 {strides = array<i32>} : memref<32x16xf32, #tpu.memory_space<vmem>>, vector<32x16xf32>,
    return
  }
  func.func @transform_0(%arg0: i32) -> (i32, i32) {
    %c0_i32 = arith.constant 0 : i32
    %c0_i32_0 = arith.constant 0 : i32
    return %arg0, %c0_i32 : i32, i32
  }
  func.func @transform_1(%arg0: i32) -> (i32, i32) {
    %c0_i32 = arith.constant 0 : i32
    %c0_i32_0 = arith.constant 0 : i32
    %c0_i32_1 = arith.constant 0 : i32
    return %c0_i32, %c0_i32_0 : i32, i32
  }
  func.func @transform_2(%arg0: i32) -> (i32, i32) {
    %c0_i32 = arith.constant 0 : i32
    %c0_i32_0 = arith.constant 0 : i32
    %c0_i32_1 = arith.constant 0 : i32
    return %c0_i32, %c0_i32_0 : i32, i32
  }
  func.func @transform_3(%arg0: i32) -> (i32, i32) {
    %c0_i32 = arith.constant 0 : i32
    %c0_i32_0 = arith.constant 0 : i32
    %c0_i32_1 = arith.constant 0 : i32
    return %c0_i32, %c0_i32_0 : i32, i32
  }
  func.func @transform_4(%arg0: i32) -> (i32, i32) {
    %c0_i32 = arith.constant 0 : i32
    %c0_i32_0 = arith.constant 0 : i32
    %c0_i32_1 = arith.constant 0 : i32
    return %c0_i32, %c0_i32_0 : i32, i32
  }
  func.func @transform_5(%arg0: i32) -> (i32, i32) {
    %c0_i32 = arith.constant 0 : i32
    %c0_i32_0 = arith.constant 0 : i32
    %c0_i32_1 = arith.constant 0 : i32
    return %c0_i32, %c0_i32_0 : i32, i32
  }
  func.func @transform_6(%arg0: i32) -> (i32, i32) {
    %c0_i32 = arith.constant 0 : i32
    %c0_i32_0 = arith.constant 0 : i32
    %c0_i32_1 = arith.constant 0 : i32
    return %c0_i32, %c0_i32_0 : i32, i32
  }
  func.func @transform_7(%arg0: i32) -> (i32, i32) {
    %c0_i32 = arith.constant 0 : i32
    %c0_i32_0 = arith.constant 0 : i32
    return %arg0, %c0_i32 : i32, i32
  }
}

</mosaic_0001>

<bundles_post_ra>
// kernel: tpu_custom_call.1
= control target key start
LH: loop header
LB: loop body
LE: loop exit
PB: predicated region body
PF: predicated region fallthrough
CT: control target
= control target key end

     0   :  { %s709_s24 = smov 0   ;;  %s784_s0 = inlined_call_operand.vmem [shape: f32[64,32], index: 0, kind: input, shape index: {}]   ;;  %s785_s1 = inlined_call_operand.vmem [shape: bf16[32,128], index: 1, kind: input, shape index: {}]   ;;  %s786_s2 = inlined_call_operand.vmem [shape: f32[1,128], index: 2, kind: input, shape index: {}]   ;;  %s787_s3 = inlined_call_operand.vmem [shape: bf16[128,64], index: 3, kind: input, shape index: {}]   ;;  %s788_s4 = inlined_call_operand.vmem [shape: f32[1,64], index: 4, kind: input, shape index: {}]   ;;  %s789_s5 = inlined_call_operand.vmem [shape: bf16[64,16], index: 5, kind: input, shape index: {}]   ;;  %s790_s6 = inlined_call_operand.vmem [shape: f32[1,16], index: 6, kind: input, shape index: {}]   ;;  %s791_s7 = inlined_call_operand.vmem [shape: f32[64,16], index: 7, kind: output, shape index: {}]  }
   0x1 LB: > { %s557_s25 = sadd.s32 4294967295, %s667_s24   ;;  %p561_p0 = scmp.ge.s32.totalorder %s667_s24, 1  ;;  %s667_s24 = sphi %s709_s24, %s17_s24  }
   0x2   : > { %p238_p1 = scmp.lt.s32.totalorder %s667_s24, 3 }
   0x4   : > { %p239_p2 = pnand %p561_p0, %p238_p1 }
   0x5   : > { %s562_s28 = sshll.u32 (!%p239_p2), %s557_s25, 2 }
   0x6   : > { %242 = sbr.rel (%p239_p2) target bundleno = 464 (0x1d0), region = 48  ;;  %p271_p3 = scmp.lt.s32.totalorder (!%p239_p2), %s562_s28, 7 }
   0xb   : > { %v629_v0 = vld [vmem:[%s785_s1 + $0x8] sm:$0xff]  ;;  %v637_v1 = vld [vmem:[%s787_s3 + $0x38] sm:$0xff]  ;;  %v628_v2 = vld [vmem:[%s785_s1] sm:$0xff]  ;;  %s793_s28 = smov (!%p271_p3, %s562_s28), 7  ;;  %vm309_vm0 = vcmask 261120   ;;  %vm470_vm1 = vcmask 523264  }
   0xc   : > { %322 = vmatpush.bf16.msra.mxu0 %v629_v0  ;;  %409 = vmatpush.bf16.msra.mxu1 %v637_v1  ;;  %v636_v3 = vld [vmem:[%s787_s3 + $0x30] sm:$0xff]  ;;  %s563_s12 = sshll.u32 %s793_s28, 3  ;;  %v635_v4 = vld [vmem:[%s787_s3 + $0x28] sm:$0xff]  ;;  %v634_v8 = vld [vmem:[%s787_s3 + $0x20] sm:$0xff]  ;;  %vm496_vm2 = vcmask 130048  }
   0xd   : > { %642 = vmatpush.bf16.msra.mxu3 %v637_v1  ;;  %s274_s15 = scalar_lea.vmem %s784_s0, %s563_s12  ;;  %v633_v12 = vld [vmem:[%s787_s3 + $0x18] sm:$0xff]  ;;  %v632_v13 = vld [vmem:[%s787_s3 + $0x10] sm:$0xff]  ;;  %v631_v14 = vld [vmem:[%s787_s3 + $0x8] sm:$0xff]  ;;  %s280_s25 = scalar_lea.vmem %s791_s7, %s563_s12 }
   0xe   : > { %v283_v5 = vld [vmem:[%s274_s15] sm:$0xff]  ;;  %v284_v6 = vld [vmem:[%s274_s15 + $0x8] sm:$0xff]  ;;  %v285_v9 = vld [vmem:[%s274_s15 + $0x10] sm:$0xff] }
   0xf   : > { %v287_v7 = vpack.c.bf16 %v284_v6, %v283_v5  ;;  %v286_v10 = vld [vmem:[%s274_s15 + $0x18] sm:$0xff]  ;;  %v630_v15 = vld [vmem:[%s787_s3] sm:$0xff]  ;;  %v640_v32 = vld [vmem:[%s789_s5 + $0x10] sm:$0xff] }
  0x10   : > { %323 = vmatpush.bf16.msra.mxu0 %v628_v2  ;;  %410 = vmatpush.bf16.msra.mxu1 %v636_v3  ;;  %v288_v11 = vpack.c.bf16 %v286_v10, %v285_v9  ;;  %v658_v17 = vld [vmem:[%s786_s2] ss:$0 sm:$0xff]  ;;  %v641_v31 = vld [vmem:[%s789_s5 + $0x18] sm:$0xff]  ;;  %v639_v33 = vld [vmem:[%s789_s5 + $0x8] sm:$0xff] }
  0x11   : > { %643 = vmatpush.bf16.msra.mxu3 %v636_v3  ;;  %481 = vmatpush.bf16.msra.mxu2 %v641_v31  ;;  %v638_v34 = vld [vmem:[%s789_s5] sm:$0xff] }
  0x12   : > { %v659_v36 = vld [vmem:[%s788_s4] ss:$0 sm:$0xff] }
  0x13   : > { %574 = vmatmul.msk.bf16.vlgmr.msra.gmra.mxu0 %vm309_vm0, %v287_v7  ;;  %v660_v50 = vld [vmem:[%s790_s6] ss:$0 sm:$0xff] }
  0x14   : > { %411 = vmatpush.bf16.msra.mxu1 %v635_v4 }
  0x15   : > { %644 = vmatpush.bf16.msra.mxu3 %v635_v4  ;;  %482 = vmatpush.bf16.msra.mxu2 %v640_v32 }
  0x18   : > { %412 = vmatpush.bf16.msra.mxu1 %v634_v8 }
  0x19   : > { %645 = vmatpush.bf16.msra.mxu3 %v634_v8  ;;  %483 = vmatpush.bf16.msra.mxu2 %v639_v33 }
  0x1c   : > { %413 = vmatpush.bf16.msra.mxu1 %v633_v12 }
  0x1d   : > { %646 = vmatpush.bf16.msra.mxu3 %v633_v12  ;;  %484 = vmatpush.bf16.msra.mxu2 %v638_v34 }
  0x20   : > { %414 = vmatpush.bf16.msra.mxu1 %v632_v13 }
  0x21   : > { %647 = vmatpush.bf16.msra.mxu3 %v632_v13 }
  0x23   : > { %575 = vmatmul.msk.bf16.gmra.mxu0 %vm309_vm0, %v288_v11 }
  0x24   : > { %415 = vmatpush.bf16.msra.mxu1 %v631_v14 }
  0x25   : > { %648 = vmatpush.bf16.msra.mxu3 %v631_v14 }
  0x28   : > { %416 = vmatpush.bf16.msra.mxu1 %v630_v15 }
  0x29   : > { %649 = vmatpush.bf16.msra.mxu3 %v630_v15 }
  0x90   : > { %v325_v16 = vpop.f32.mrf.mxu0 }
  0x91   : > { %v326_v18 = vadd.f32 %v658_v17, %v325_v16 }
  0x93   : > { %v335_v21 = vmax.f32 %v326_v18, 0.0 }
  0x98   : > { %v327_v19 = vpop.f32.mrf.mxu0 }
  0x99   : > { %v328_v20 = vadd.f32 %v658_v17, %v327_v19 }
  0x9b   : > { %v336_v22 = vmax.f32 %v328_v20, 0.0 }
  0x9d   : > { %v339_v23 = vpack.c.bf16 %v336_v22, %v335_v21 }
  0x9f   : > { %417 = vmatmul.bf16.vlgmr.msra.gmra.mxu1 %v339_v23 }
  0xa0   : > { %v330_v24 = vpop.f32.mrf.mxu0 }
  0xa1   : > { %v331_v25 = vadd.f32 %v658_v17, %v330_v24 }
  0xa3   : > { %v337_v28 = vmax.f32 %v331_v25, 0.0 }
  0xa8   : > { %v332_v26 = vpop.f32.mrf.mxu0 }
  0xa9   : > { %v333_v27 = vadd.f32 %v658_v17, %v332_v26 }
  0xab   : > { %v338_v29 = vmax.f32 %v333_v27, 0.0 }
  0xad   : > { %v340_v30 = vpack.c.bf16 %v338_v29, %v337_v28 }
  0xaf   : > { %422 = vmatmul.bf16.vlgmr.msra.gmra.mxu3 %v340_v30 }
 0x11c   : > { %v418_v35 = vpop.f32.mrf.mxu1 }
 0x11d   : > { %v419_v37 = vadd.f32 %v659_v36, %v418_v35 }
 0x11f   : > { %v428_v40 = vmax.f32 %v419_v37, 0.0 }
 0x124   : > { %v420_v38 = vpop.f32.mrf.mxu1 }
 0x125   : > { %v421_v39 = vadd.f32 %v659_v36, %v420_v38 }
 0x127   : > { %v429_v41 = vmax.f32 %v421_v39, 0.0 }
 0x129   : > { %v432_v42 = vpack.c.bf16 %v429_v41, %v428_v40 }
 0x12b   : > { %624 = vmatmul.msk.bf16.vlgmr.msra.gmra.mxu2 %vm470_vm1, %v432_v42 }
 0x132   : > { %v423_v43 = vpop.f32.mrf.mxu3 }
 0x133   : > { %v424_v44 = vadd.f32 %v659_v36, %v423_v43 }
 0x135   : > { %v430_v47 = vmax.f32 %v424_v44, 0.0 }
 0x13a   : > { %v425_v45 = vpop.f32.mrf.mxu3 }
 0x13b   : > { %v426_v46 = vadd.f32 %v659_v36, %v425_v45 }
 0x13d   : > { %v431_v48 = vmax.f32 %v426_v46, 0.0 }
 0x13f   : > { %v433_v49 = vpack.c.bf16 %v431_v48, %v430_v47 }
 0x141   : > { %625 = vmatmul.msk.bf16.gmra.mxu2 %vm470_vm1, %v433_v49 }
 0x1ae   : > { %v486_v51 = vpop.f32.mrf.mxu2 }
 0x1af   : > { %v487_v52 = vadd.f32 %v660_v50, %v486_v51 }
 0x1b1   : > { %497 = vst.msk [vmem:[%s280_s25] sm:$0xff] %vm496_vm2, %v487_v52 }
 0x1b6   : > { %v488_v53 = vpop.f32.mrf.mxu2 }
 0x1b7   : > { %v489_v54 = vadd.f32 %v660_v50, %v488_v53 }
 0x1b9   : > { %498 = vst.msk [vmem:[%s280_s25 + $0x8] sm:$0xff] %vm496_vm2, %v489_v54 }
 0x1c4   : > { %v491_v55 = vpop.f32.mrf.mxu2 }
 0x1c5   : > { %v492_v56 = vadd.f32 %v660_v50, %v491_v55 }
 0x1c7   : > { %499 = vst.msk [vmem:[%s280_s25 + $0x10] sm:$0xff] %vm496_vm2, %v492_v56 }
 0x1cc   : > { %v493_v57 = vpop.f32.mrf.mxu2 }
 0x1cd   : > { %v494_v58 = vadd.f32 %v660_v50, %v493_v57 }
 0x1cf   : > { %500 = vst.msk [vmem:[%s280_s25 + $0x18] sm:$0xff] %vm496_vm2, %v494_v58 }
 0x1d0 PF: > { %s17_s24 = sadd.s32 1, %s667_s24  }
 0x1d1   : > { %p14_p4 = scmp.ge.s32.totalorder %s17_s24, 4  }
 0x1d3   :  { %16 = sbr.rel (!%p14_p4) target bundleno = 1 (0x1), region = 78 }

</bundles_post_ra>
